<compile_context>
chip_gen: v5e
topology: v5e:2x2
jax: 0.10.0
libtpu: 0.0.40
codegen_flags: <defaults>
</compile_context>

<pallas_src>
import jax
import jax.numpy as jnp
import numpy as np
from jax.experimental import pallas as pl
from jax.experimental.pallas import tpu as pltpu

EPS = 1e-5


# --------------------------------- helpers ---------------------------------

def _round_up(x, m):
    return (x + m - 1) // m * m


def _pick_tm(m):
    """M tile for the conv matmuls (256-aligned when M is large)."""
    if m >= 512:
        return 256
    if m >= 128:
        return 128
    return _round_up(m, 8)


def _pick_tk(kp):
    """K tile (kp is already a multiple of 128)."""
    for t in (512, 384, 256, 128):
        if kp % t == 0:
            return t
    return kp


def _pick_rows_tile(rows, lanes, out_bytes):
    """Row tile for the memory-bound elementwise kernels.

    Prefer the biggest tile that divides `rows` while keeping a single output
    block around ~2 MiB so double-buffered in/out stays well inside the
    default scoped-VMEM budget on v5e/v6e/v7x.
    """
    max_rows = max(8, (2 << 20) // (lanes * out_bytes))
    for t in (1024, 512, 256, 128, 64, 32, 16, 8):
        if t <= max_rows and rows % t == 0:
            return t
    return rows


# ------------------------------ Pallas kernels ------------------------------

def _conv_mm_kernel(a_ref, b_ref, y_ref, st_ref, acc_ref):
    """One (tm, Cp) output tile of the im2col conv matmul.

    grid = (M_tiles, K_tiles); the K axis ("arbitrary", innermost) accumulates
    into an f32 VMEM scratch.  On the last K step the tile is written out in
    bf16 together with its per-channel sum / sum-of-squares, so the BN batch
    statistics never require re-reading the conv output from HBM.
    """
    k = pl.program_id(1)

    @pl.when(k == 0)
    def _():
        acc_ref[...] = jnp.zeros_like(acc_ref)

    acc_ref[...] += jnp.dot(a_ref[...], b_ref[...],
                            preferred_element_type=jnp.float32)

    @pl.when(k == pl.num_programs(1) - 1)
    def _():
        y = acc_ref[...]
        y_ref[...] = y.astype(y_ref.dtype)
        st_ref[0, 0:1, :] = jnp.sum(y, axis=0, keepdims=True)
        st_ref[0, 1:2, :] = jnp.sum(y * y, axis=0, keepdims=True)


def _bn_relu_kernel(x_ref, s_ref, b_ref, o_ref):
    # out = relu(x * scale + shift); scale/shift are (1, Cp) f32 rows.
    y = x_ref[...].astype(jnp.float32) * s_ref[...] + b_ref[...]
    o_ref[...] = jnp.maximum(y, 0.0).astype(o_ref.dtype)


def _bn_add_bn_relu_kernel(x_ref, sx_ref, bx_ref, r_ref, sr_ref, br_ref, o_ref):
    # out = relu(bn2(conv2) + bn_sc(shortcut)), both BNs folded to affine.
    y = (x_ref[...].astype(jnp.float32) * sx_ref[...] + bx_ref[...]
         + r_ref[...].astype(jnp.float32) * sr_ref[...] + br_ref[...])
    o_ref[...] = jnp.maximum(y, 0.0).astype(o_ref.dtype)


# ----------------------------- Pallas wrappers ------------------------------

def pallas_conv_matmul(a, b):
    """(M, K) x (K, C) bf16 matmul with fused per-channel sum / sum-of-squares.

    Rows are zero-padded to a multiple of the M tile, K and C to multiples of
    128 (zero rows/cols contribute nothing to the result or the statistics).
    Returns (y (Mp, Cp) bf16, chan_sum (Cp,) f32, chan_sumsq (Cp,) f32).
    """
    m, kdim = a.shape
    _, c = b.shape
    tm = _pick_tm(m)
    mp = _round_up(m, tm)
    kp = _round_up(kdim, 128)
    cp = _round_up(c, 128)
    tk = _pick_tk(kp)
    a = jnp.pad(a.astype(jnp.bfloat16), ((0, mp - m), (0, kp - kdim)))
    b = jnp.pad(b.astype(jnp.bfloat16), ((0, kp - kdim), (0, cp - c)))
    grid_m, grid_k = mp // tm, kp // tk

    y, st = pl.pallas_call(
        _conv_mm_kernel,
        out_shape=(jax.ShapeDtypeStruct((mp, cp), jnp.bfloat16),
                   jax.ShapeDtypeStruct((grid_m, 2, cp), jnp.float32)),
        grid=(grid_m, grid_k),
        in_specs=[pl.BlockSpec((tm, tk), lambda i, k: (i, k)),
                  pl.BlockSpec((tk, cp), lambda i, k: (k, 0))],
        out_specs=(pl.BlockSpec((tm, cp), lambda i, k: (i, 0)),
                   pl.BlockSpec((1, 2, cp), lambda i, k: (i, 0, 0))),
        scratch_shapes=[pltpu.VMEM((tm, cp), jnp.float32)],
        compiler_params=pltpu.CompilerParams(
            dimension_semantics=("parallel", "arbitrary")),
    )(a, b)
    sums = jnp.sum(st, axis=0)          # (2, Cp): tiny per-tile reduction
    return y, sums[0], sums[1]


def pallas_bn_relu(x, scale, shift):
    """relu(x * scale + shift); x is (Mp, Cp), scale/shift (Cp,); bf16 out."""
    mp, cp = x.shape
    tr = _pick_rows_tile(mp, cp, out_bytes=2)
    s2 = scale.reshape(1, cp).astype(jnp.float32)
    b2 = shift.reshape(1, cp).astype(jnp.float32)
    return pl.pallas_call(
        _bn_relu_kernel,
        out_shape=jax.ShapeDtypeStruct((mp, cp), jnp.bfloat16),
        grid=(mp // tr,),
        in_specs=[pl.BlockSpec((tr, cp), lambda i: (i, 0)),
                  pl.BlockSpec((1, cp), lambda i: (0, 0)),
                  pl.BlockSpec((1, cp), lambda i: (0, 0))],
        out_specs=pl.BlockSpec((tr, cp), lambda i: (i, 0)),
        compiler_params=pltpu.CompilerParams(
            dimension_semantics=("parallel",)),
    )(x, s2, b2)


def pallas_bn_add_bn_relu(x, sx, bx, res, sr, br):
    """relu(x*sx + bx + res*sr + br); x, res are (Mp, Cp); f32 output."""
    mp, cp = x.shape
    tr = _pick_rows_tile(mp, cp, out_bytes=4)

    def row(v):
        return v.reshape(1, cp).astype(jnp.float32)

    big_spec = pl.BlockSpec((tr, cp), lambda i: (i, 0))
    vec_spec = pl.BlockSpec((1, cp), lambda i: (0, 0))
    return pl.pallas_call(
        _bn_add_bn_relu_kernel,
        out_shape=jax.ShapeDtypeStruct((mp, cp), jnp.float32),
        grid=(mp // tr,),
        in_specs=[big_spec, vec_spec, vec_spec, big_spec, vec_spec, vec_spec],
        out_specs=big_spec,
        compiler_params=pltpu.CompilerParams(
            dimension_semantics=("parallel",)),
    )(x, row(sx), row(bx), res, row(sr), row(br))


# --------------------------------- JAX glue ---------------------------------

def _im2col(x_nhwc, ksize, stride, pad):
    """k x k patches; column order (kh, kw, cin).  Returns ((M, K), (n,ho,wo))."""
    n, h, w, c = x_nhwc.shape
    xp = jnp.pad(x_nhwc, ((0, 0), (pad, pad), (pad, pad), (0, 0)))
    ho = (h + 2 * pad - ksize) // stride + 1
    wo = (w + 2 * pad - ksize) // stride + 1
    cols = []
    for kh in range(ksize):
        for kw in range(ksize):
            cols.append(xp[:, kh:kh + stride * ho:stride,
                           kw:kw + stride * wo:stride, :])   # (n, ho, wo, c)
    patches = jnp.concatenate(cols, axis=-1)                  # (n, ho, wo, k*k*c)
    return patches.reshape(n * ho * wo, ksize * ksize * c), (n, ho, wo)


def _w_to_mat(w):
    """PyTorch (Cout, Cin, KH, KW) -> (KH*KW*Cin, Cout), matching _im2col."""
    cout, cin, kh, kw = w.shape
    return jnp.transpose(w, (2, 3, 1, 0)).reshape(kh * kw * cin, cout)


def _bn_scale_shift(chan_sum, chan_sumsq, count, gamma, beta, cp, eps=EPS):
    """Training-mode BN (biased batch variance) folded to per-channel affine.

    chan_sum / chan_sumsq are channel-padded to Cp (padded channels are all
    zero); gamma/beta are zero-padded so padded channels map to exactly 0.
    """
    gp = jnp.pad(gamma.astype(jnp.float32), (0, cp - gamma.shape[0]))
    bp = jnp.pad(beta.astype(jnp.float32), (0, cp - beta.shape[0]))
    mean = chan_sum / count
    var = jnp.maximum(chan_sumsq / count - mean * mean, 0.0)
    scale = gp / jnp.sqrt(var + eps)
    shift = bp - mean * scale
    return scale, shift


def basic_block_forward(x_nchw, params, stride):
    n, cin, h, w = x_nchw.shape
    planes = params["w1"].shape[0]
    x_nhwc = jnp.transpose(x_nchw, (0, 2, 3, 1)).astype(jnp.float32)
    x_bf = x_nhwc.astype(jnp.bfloat16)

    # conv1 (3x3, stride, pad 1) + bn1 + relu
    a1, (_, ho, wo) = _im2col(x_bf, 3, stride, 1)
    m = n * ho * wo
    y1, s1_sum, s1_sq = pallas_conv_matmul(a1, _w_to_mat(params["w1"]))
    cp1 = y1.shape[1]
    sc1, sh1 = _bn_scale_shift(s1_sum, s1_sq, m, params["g1"], params["be1"], cp1)
    y1r = pallas_bn_relu(y1, sc1, sh1)                 # (Mp, Cp) bf16

    # conv2 (3x3, stride 1, pad 1) + bn2
    y1_nhwc = y1r[:m, :planes].reshape(n, ho, wo, planes)
    a2, _ = _im2col(y1_nhwc, 3, 1, 1)
    y2, s2_sum, s2_sq = pallas_conv_matmul(a2, _w_to_mat(params["w2"]))
    mp, cp2 = y2.shape
    sc2, sh2 = _bn_scale_shift(s2_sum, s2_sq, m, params["g2"], params["be2"], cp2)

    # shortcut (1x1 projection conv + BN, or identity)
    if stride != 1 or cin != planes:
        xs = x_bf[:, ::stride, ::stride, :].reshape(m, cin)
        res, sr_sum, sr_sq = pallas_conv_matmul(xs, _w_to_mat(params["ws"]))
        scr, shr = _bn_scale_shift(sr_sum, sr_sq, m,
                                   params["gs"], params["bes"], cp2)
    else:
        res = jnp.pad(x_bf.reshape(m, cin), ((0, mp - m), (0, cp2 - cin)))
        scr = jnp.pad(jnp.ones((planes,), jnp.float32), (0, cp2 - planes))
        shr = jnp.zeros((cp2,), jnp.float32)

    # out = relu(bn2(conv2) + bn_shortcut(shortcut))
    out = pallas_bn_add_bn_relu(y2, sc2, sh2, res, scr, shr)  # (Mp, Cp) f32
    out = out[:m, :planes].reshape(n, ho, wo, planes)
    return jnp.transpose(out, (0, 3, 1, 2))


# ----------------------------- pure-JAX reference ---------------------------

def _reference_forward(x_nchw, params, stride):
    def conv(x_nhwc, w, s):
        w_hwio = jnp.transpose(w, (2, 3, 1, 0))
        ph, pw = w.shape[2] // 2, w.shape[3] // 2
        return jax.lax.conv_general_dilated(
            x_nhwc, w_hwio, (s, s), padding=[(ph, ph), (pw, pw)],
            dimension_numbers=("NHWC", "HWIO", "NHWC"),
            precision=jax.lax.Precision.HIGHEST)

    def bn(y, g, b):
        mmean = jnp.mean(y, axis=(0, 1, 2))
        v = jnp.var(y, axis=(0, 1, 2))
        return (y - mmean) / jnp.sqrt(v + EPS) * g + b

    planes = params["w1"].shape[0]
    x_nhwc = jnp.transpose(x_nchw, (0, 2, 3, 1)).astype(jnp.float32)
    o = jax.nn.relu(bn(conv(x_nhwc, params["w1"], stride),
                       params["g1"], params["be1"]))
    o = bn(conv(o, params["w2"], 1), params["g2"], params["be2"])
    if stride != 1 or x_nchw.shape[1] != planes:
        sc = bn(conv(x_nhwc, params["ws"], stride), params["gs"], params["bes"])
    else:
        sc = x_nhwc
    return jnp.transpose(jax.nn.relu(o + sc), (0, 3, 1, 2))


# ----------------------------------- main -----------------------------------

def init_params(key, in_planes, planes, stride):
    ks = jax.random.split(key, 9)
    p = {
        "w1": 0.1 * jax.random.normal(ks[0], (planes, in_planes, 3, 3), jnp.float32),
        "g1": 1.0 + 0.1 * jax.random.normal(ks[1], (planes,), jnp.float32),
        "be1": 0.1 * jax.random.normal(ks[2], (planes,), jnp.float32),
        "w2": 0.1 * jax.random.normal(ks[3], (planes, planes, 3, 3), jnp.float32),
        "g2": 1.0 + 0.1 * jax.random.normal(ks[4], (planes,), jnp.float32),
        "be2": 0.1 * jax.random.normal(ks[5], (planes,), jnp.float32),
    }
    if stride != 1 or in_planes != planes:
        p["ws"] = 0.1 * jax.random.normal(ks[6], (planes, in_planes, 1, 1), jnp.float32)
        p["gs"] = 1.0 + 0.1 * jax.random.normal(ks[7], (planes,), jnp.float32)
        p["bes"] = 0.1 * jax.random.normal(ks[8], (planes,), jnp.float32)
    return p


if __name__ == "__main__":
    key = jax.random.PRNGKey(0)
    k_x1, k_p1, k_x2, k_p2 = jax.random.split(key, 4)
    fwd = jax.jit(basic_block_forward, static_argnames=("stride",))

    # Case 1: projection shortcut (stride 2, channel expansion).
    x1 = jax.random.normal(k_x1, (2, 4, 16, 16), jnp.float32)
    p1 = init_params(k_p1, 4, 8, 2)
    out1 = jax.block_until_ready(fwd(x1, p1, stride=2))
    ref1 = jax.block_until_ready(_reference_forward(x1, p1, 2))
    np.testing.assert_allclose(np.asarray(out1, dtype=np.float32),
                               np.asarray(ref1, dtype=np.float32),
                               rtol=3e-2, atol=3e-2)

    # Case 2: identity shortcut (stride 1, same channel count).
    x2 = jax.random.normal(k_x2, (2, 8, 16, 16), jnp.float32)
    p2 = init_params(k_p2, 8, 8, 1)
    out2 = jax.block_until_ready(fwd(x2, p2, stride=1))
    ref2 = jax.block_until_ready(_reference_forward(x2, p2, 1))
    np.testing.assert_allclose(np.asarray(out2, dtype=np.float32),
                               np.asarray(ref2, dtype=np.float32),
                               rtol=3e-2, atol=3e-2)

    print("KERNEL_OK")
</pallas_src>

<mosaic_0001>
module attributes {stable_mosaic.version = 11 : i64} {
  func.func @_conv_mm_kernel(%arg0: i32, %arg1: i32, %arg2: memref<128x128xbf16, #tpu.memory_space<vmem>>, %arg3: memref<128x128xbf16, #tpu.memory_space<vmem>>, %arg4: memref<128x128xbf16, #tpu.memory_space<vmem>>, %arg5: memref<1x2x128xf32, #tpu.memory_space<vmem>>, %arg6: memref<128x128xf32, #tpu.memory_space<vmem>>) attributes {dimension_semantics = [#tpu.dimension_semantics<parallel>, #tpu.dimension_semantics<arbitrary>], iteration_bounds = array<i64: 1, 1>, scalar_prefetch = 0 : i64, scratch_operands = 1 : i64, tpu.core_type = #tpu.core_type<tc>, window_params = [{transform_indices = @transform_0, window_bounds = array<i64: 128, 128>}, {transform_indices = @transform_1, window_bounds = array<i64: 128, 128>}, {transform_indices = @transform_2, window_bounds = array<i64: 128, 128>}, {transform_indices = @transform_3, window_bounds = array<i64: 1, 2, 128>}]} {
    %c0_i32 = arith.constant 0 : i32
    %0 = arith.cmpi eq, %arg1, %c0_i32 : i32
    %1 = arith.extui %0 : i1 to i32
    %c0_i32_0 = arith.constant 0 : i32
    %2 = arith.cmpi ne, %1, %c0_i32_0 : i32
    scf.if %2 {
      %cst_10 = arith.constant 0.000000e+00 : f32
      %12 = vector.broadcast %cst_10 : f32 to vector<128x128xf32>
      %c0_11 = arith.constant 0 : index
      %c0_12 = arith.constant 0 : index
      %13 = vector.load %arg6[%c0_11, %c0_12] : memref<128x128xf32, #tpu.memory_space<vmem>>, vector<128x128xf32>
      tpu.vector_store %arg6[%c0_11, %c0_12], %12 {strides = array<i32>} : memref<128x128xf32, #tpu.memory_space<vmem>>, vector<128x128xf32>,
    } else {
    }
    %c0 = arith.constant 0 : index
    %c0_1 = arith.constant 0 : index
    %3 = vector.load %arg6[%c0, %c0_1] : memref<128x128xf32, #tpu.memory_space<vmem>>, vector<128x128xf32>
    %c0_2 = arith.constant 0 : index
    %c0_3 = arith.constant 0 : index
    %4 = vector.load %arg2[%c0_2, %c0_3] : memref<128x128xbf16, #tpu.memory_space<vmem>>, vector<128x128xbf16>
    %c0_4 = arith.constant 0 : index
    %c0_5 = arith.constant 0 : index
    %5 = vector.load %arg3[%c0_4, %c0_5] : memref<128x128xbf16, #tpu.memory_space<vmem>>, vector<128x128xbf16>
    %cst = arith.constant dense<0.000000e+00> : vector<128x128xf32>
    %6 = tpu.matmul %4, %5, %cst {dimension_numbers = #tpu.dot_dimension_numbers<[1], [0], [0], [1], [0, 0, 1, 1], [], []>} : vector<128x128xbf16>, vector<128x128xbf16>, vector<128x128xf32> -> vector<128x128xf32>
    %7 = arith.addf %3, %6 : vector<128x128xf32>
    %c0_6 = arith.constant 0 : index
    %c0_7 = arith.constant 0 : index
    %8 = vector.load %arg6[%c0_6, %c0_7] : memref<128x128xf32, #tpu.memory_space<vmem>>, vector<128x128xf32>
    tpu.vector_store %arg6[%c0_6, %c0_7], %7 {strides = array<i32>} : memref<128x128xf32, #tpu.memory_space<vmem>>, vector<128x128xf32>,
    %c0_i32_8 = arith.constant 0 : i32
    %9 = arith.cmpi eq, %arg1, %c0_i32_8 : i32
    %10 = arith.extui %9 : i1 to i32
    %c0_i32_9 = arith.constant 0 : i32
    %11 = arith.cmpi ne, %10, %c0_i32_9 : i32
    scf.if %11 {
      %c0_10 = arith.constant 0 : index
      %c0_11 = arith.constant 0 : index
      %12 = vector.load %arg6[%c0_10, %c0_11] : memref<128x128xf32, #tpu.memory_space<vmem>>, vector<128x128xf32>
      %13 = arith.truncf %12 : vector<128x128xf32> to vector<128x128xbf16>
      %c0_12 = arith.constant 0 : index
      %c0_13 = arith.constant 0 : index
      %14 = vector.load %arg4[%c0_12, %c0_13] : memref<128x128xbf16, #tpu.memory_space<vmem>>, vector<128x128xbf16>
      tpu.vector_store %arg4[%c0_12, %c0_13], %13 {strides = array<i32>} : memref<128x128xbf16, #tpu.memory_space<vmem>>, vector<128x128xbf16>,
      %cst_14 = arith.constant dense<0.000000e+00> : vector<128xf32>
      %15 = vector.multi_reduction <add>, %12, %cst_14 [0] : vector<128x128xf32> to vector<128xf32>
      %16 = vector.shape_cast %15 : vector<128xf32> to vector<1x128xf32>
      %c0_15 = arith.constant 0 : index
      %c0_16 = arith.constant 0 : index
      %c0_17 = arith.constant 0 : index
      %17 = vector.load %arg5[%c0_15, %c0_16, %c0_17] : memref<1x2x128xf32, #tpu.memory_space<vmem>>, vector<1x1x128xf32>
      %18 = vector.shape_cast %17 : vector<1x1x128xf32> to vector<1x128xf32>
      %19 = vector.shape_cast %16 : vector<1x128xf32> to vector<1x1x128xf32>
      tpu.vector_store %arg5[%c0_15, %c0_16, %c0_17], %19 {strides = array<i32>} : memref<1x2x128xf32, #tpu.memory_space<vmem>>, vector<1x1x128xf32>,
      %20 = arith.mulf %12, %12 : vector<128x128xf32>
      %cst_18 = arith.constant dense<0.000000e+00> : vector<128xf32>
      %21 = vector.multi_reduction <add>, %20, %cst_18 [0] : vector<128x128xf32> to vector<128xf32>
      %22 = vector.shape_cast %21 : vector<128xf32> to vector<1x128xf32>
      %c0_19 = arith.constant 0 : index
      %c1 = arith.constant 1 : index
      %c0_20 = arith.constant 0 : index
      %23 = vector.load %arg5[%c0_19, %c1, %c0_20] : memref<1x2x128xf32, #tpu.memory_space<vmem>>, vector<1x1x128xf32>
      %24 = vector.shape_cast %23 : vector<1x1x128xf32> to vector<1x128xf32>
      %25 = vector.shape_cast %22 : vector<1x128xf32> to vector<1x1x128xf32>
      tpu.vector_store %arg5[%c0_19, %c1, %c0_20], %25 {strides = array<i32>} : memref<1x2x128xf32, #tpu.memory_space<vmem>>, vector<1x1x128xf32>,
    } else {
    }
    return
  }
  func.func @transform_0(%arg0: i32, %arg1: i32) -> (i32, i32) {
    %c0_i32 = arith.constant 0 : i32
    return %arg0, %arg1 : i32, i32
  }
  func.func @transform_1(%arg0: i32, %arg1: i32) -> (i32, i32) {
    %c0_i32 = arith.constant 0 : i32
    %c0_i32_0 = arith.constant 0 : i32
    return %arg1, %c0_i32 : i32, i32
  }
  func.func @transform_2(%arg0: i32, %arg1: i32) -> (i32, i32) {
    %c0_i32 = arith.constant 0 : i32
    %c0_i32_0 = arith.constant 0 : i32
    return %arg0, %c0_i32 : i32, i32
  }
  func.func @transform_3(%arg0: i32, %arg1: i32) -> (i32, i32, i32) {
    %c0_i32 = arith.constant 0 : i32
    %c0_i32_0 = arith.constant 0 : i32
    %c0_i32_1 = arith.constant 0 : i32
    return %arg0, %c0_i32, %c0_i32_0 : i32, i32, i32
  }
}

module attributes {stable_mosaic.version = 11 : i64} {
  func.func @_bn_relu_kernel(%arg0: i32, %arg1: memref<128x128xbf16, #tpu.memory_space<vmem>>, %arg2: memref<1x128xf32, #tpu.memory_space<vmem>>, %arg3: memref<1x128xf32, #tpu.memory_space<vmem>>, %arg4: memref<128x128xbf16, #tpu.memory_space<vmem>>) attributes {dimension_semantics = [#tpu.dimension_semantics<parallel>], iteration_bounds = array<i64: 1>, scalar_prefetch = 0 : i64, scratch_operands = 0 : i64, tpu.core_type = #tpu.core_type<tc>, window_params = [{transform_indices = @transform_0, window_bounds = array<i64: 128, 128>}, {pipeline_mode = #tpu.pipeline_mode<synchronous>, transform_indices = @transform_1, window_bounds = array<i64: 1, 128>}, {pipeline_mode = #tpu.pipeline_mode<synchronous>, transform_indices = @transform_2, window_bounds = array<i64: 1, 128>}, {transform_indices = @transform_3, window_bounds = array<i64: 128, 128>}]} {
    %c0 = arith.constant 0 : index
    %c0_0 = arith.constant 0 : index
    %0 = vector.load %arg1[%c0, %c0_0] : memref<128x128xbf16, #tpu.memory_space<vmem>>, vector<128x128xbf16>
    %1 = arith.extf %0 : vector<128x128xbf16> to vector<128x128xf32>
    %c0_1 = arith.constant 0 : index
    %c0_2 = arith.constant 0 : index
    %2 = vector.load %arg2[%c0_1, %c0_2] : memref<1x128xf32, #tpu.memory_space<vmem>>, vector<1x128xf32>
    %3 = vector.broadcast %2 : vector<1x128xf32> to vector<128x128xf32>
    %4 = arith.mulf %1, %3 : vector<128x128xf32>
    %c0_3 = arith.constant 0 : index
    %c0_4 = arith.constant 0 : index
    %5 = vector.load %arg3[%c0_3, %c0_4] : memref<1x128xf32, #tpu.memory_space<vmem>>, vector<1x128xf32>
    %6 = vector.broadcast %5 : vector<1x128xf32> to vector<128x128xf32>
    %7 = arith.addf %4, %6 : vector<128x128xf32>
    %cst = arith.constant 0.000000e+00 : f32
    %8 = vector.broadcast %cst : f32 to vector<128x128xf32>
    %9 = arith.maximumf %7, %8 : vector<128x128xf32>
    %10 = arith.truncf %9 : vector<128x128xf32> to vector<128x128xbf16>
    %c0_5 = arith.constant 0 : index
    %c0_6 = arith.constant 0 : index
    %11 = vector.load %arg4[%c0_5, %c0_6] : memref<128x128xbf16, #tpu.memory_space<vmem>>, vector<128x128xbf16>
    tpu.vector_store %arg4[%c0_5, %c0_6], %10 {strides = array<i32>} : memref<128x128xbf16, #tpu.memory_space<vmem>>, vector<128x128xbf16>,
    return
  }
  func.func @transform_0(%arg0: i32) -> (i32, i32) {
    %c0_i32 = arith.constant 0 : i32
    %c0_i32_0 = arith.constant 0 : i32
    return %arg0, %c0_i32 : i32, i32
  }
  func.func @transform_1(%arg0: i32) -> (i32, i32) {
    %c0_i32 = arith.constant 0 : i32
    %c0_i32_0 = arith.constant 0 : i32
    %c0_i32_1 = arith.constant 0 : i32
    return %c0_i32, %c0_i32_0 : i32, i32
  }
  func.func @transform_2(%arg0: i32) -> (i32, i32) {
    %c0_i32 = arith.constant 0 : i32
    %c0_i32_0 = arith.constant 0 : i32
    %c0_i32_1 = arith.constant 0 : i32
    return %c0_i32, %c0_i32_0 : i32, i32
  }
  func.func @transform_3(%arg0: i32) -> (i32, i32) {
    %c0_i32 = arith.constant 0 : i32
    %c0_i32_0 = arith.constant 0 : i32
    return %arg0, %c0_i32 : i32, i32
  }
}

module attributes {stable_mosaic.version = 11 : i64} {
  func.func @_bn_add_bn_relu_kernel(%arg0: i32, %arg1: memref<128x128xbf16, #tpu.memory_space<vmem>>, %arg2: memref<1x128xf32, #tpu.memory_space<vmem>>, %arg3: memref<1x128xf32, #tpu.memory_space<vmem>>, %arg4: memref<128x128xbf16, #tpu.memory_space<vmem>>, %arg5: memref<1x128xf32, #tpu.memory_space<vmem>>, %arg6: memref<1x128xf32, #tpu.memory_space<vmem>>, %arg7: memref<128x128xf32, #tpu.memory_space<vmem>>) attributes {dimension_semantics = [#tpu.dimension_semantics<parallel>], iteration_bounds = array<i64: 1>, scalar_prefetch = 0 : i64, scratch_operands = 0 : i64, tpu.core_type = #tpu.core_type<tc>, window_params = [{transform_indices = @transform_0, window_bounds = array<i64: 128, 128>}, {pipeline_mode = #tpu.pipeline_mode<synchronous>, transform_indices = @transform_1, window_bounds = array<i64: 1, 128>}, {pipeline_mode = #tpu.pipeline_mode<synchronous>, transform_indices = @transform_2, window_bounds = array<i64: 1, 128>}, {transform_indices = @transform_3, window_bounds = array<i64: 128, 128>}, {pipeline_mode = #tpu.pipeline_mode<synchronous>, transform_indices = @transform_4, window_bounds = array<i64: 1, 128>}, {pipeline_mode = #tpu.pipeline_mode<synchronous>, transform_indices = @transform_5, window_bounds = array<i64: 1, 128>}, {transform_indices = @transform_6, window_bounds = array<i64: 128, 128>}]} {
    %c0 = arith.constant 0 : index
    %c0_0 = arith.constant 0 : index
    %0 = vector.load %arg1[%c0, %c0_0] : memref<128x128xbf16, #tpu.memory_space<vmem>>, vector<128x128xbf16>
    %1 = arith.extf %0 : vector<128x128xbf16> to vector<128x128xf32>
    %c0_1 = arith.constant 0 : index
    %c0_2 = arith.constant 0 : index
    %2 = vector.load %arg2[%c0_1, %c0_2] : memref<1x128xf32, #tpu.memory_space<vmem>>, vector<1x128xf32>
    %3 = vector.broadcast %2 : vector<1x128xf32> to vector<128x128xf32>
    %4 = arith.mulf %1, %3 : vector<128x128xf32>
    %c0_3 = arith.constant 0 : index
    %c0_4 = arith.constant 0 : index
    %5 = vector.load %arg3[%c0_3, %c0_4] : memref<1x128xf32, #tpu.memory_space<vmem>>, vector<1x128xf32>
    %6 = vector.broadcast %5 : vector<1x128xf32> to vector<128x128xf32>
    %7 = arith.addf %4, %6 : vector<128x128xf32>
    %c0_5 = arith.constant 0 : index
    %c0_6 = arith.constant 0 : index
    %8 = vector.load %arg4[%c0_5, %c0_6] : memref<128x128xbf16, #tpu.memory_space<vmem>>, vector<128x128xbf16>
    %9 = arith.extf %8 : vector<128x128xbf16> to vector<128x128xf32>
    %c0_7 = arith.constant 0 : index
    %c0_8 = arith.constant 0 : index
    %10 = vector.load %arg5[%c0_7, %c0_8] : memref<1x128xf32, #tpu.memory_space<vmem>>, vector<1x128xf32>
    %11 = vector.broadcast %10 : vector<1x128xf32> to vector<128x128xf32>
    %12 = arith.mulf %9, %11 : vector<128x128xf32>
    %13 = arith.addf %7, %12 : vector<128x128xf32>
    %c0_9 = arith.constant 0 : index
    %c0_10 = arith.constant 0 : index
    %14 = vector.load %arg6[%c0_9, %c0_10] : memref<1x128xf32, #tpu.memory_space<vmem>>, vector<1x128xf32>
    %15 = vector.broadcast %14 : vector<1x128xf32> to vector<128x128xf32>
    %16 = arith.addf %13, %15 : vector<128x128xf32>
    %cst = arith.constant 0.000000e+00 : f32
    %17 = vector.broadcast %cst : f32 to vector<128x128xf32>
    %18 = arith.maximumf %16, %17 : vector<128x128xf32>
    %c0_11 = arith.constant 0 : index
    %c0_12 = arith.constant 0 : index
    %19 = vector.load %arg7[%c0_11, %c0_12] : memref<128x128xf32, #tpu.memory_space<vmem>>, vector<128x128xf32>
    tpu.vector_store %arg7[%c0_11, %c0_12], %18 {strides = array<i32>} : memref<128x128xf32, #tpu.memory_space<vmem>>, vector<128x128xf32>,
    return
  }
  func.func @transform_0(%arg0: i32) -> (i32, i32) {
    %c0_i32 = arith.constant 0 : i32
    %c0_i32_0 = arith.constant 0 : i32
    return %arg0, %c0_i32 : i32, i32
  }
  func.func @transform_1(%arg0: i32) -> (i32, i32) {
    %c0_i32 = arith.constant 0 : i32
    %c0_i32_0 = arith.constant 0 : i32
    %c0_i32_1 = arith.constant 0 : i32
    return %c0_i32, %c0_i32_0 : i32, i32
  }
  func.func @transform_2(%arg0: i32) -> (i32, i32) {
    %c0_i32 = arith.constant 0 : i32
    %c0_i32_0 = arith.constant 0 : i32
    %c0_i32_1 = arith.constant 0 : i32
    return %c0_i32, %c0_i32_0 : i32, i32
  }
  func.func @transform_3(%arg0: i32) -> (i32, i32) {
    %c0_i32 = arith.constant 0 : i32
    %c0_i32_0 = arith.constant 0 : i32
    return %arg0, %c0_i32 : i32, i32
  }
  func.func @transform_4(%arg0: i32) -> (i32, i32) {
    %c0_i32 = arith.constant 0 : i32
    %c0_i32_0 = arith.constant 0 : i32
    %c0_i32_1 = arith.constant 0 : i32
    return %c0_i32, %c0_i32_0 : i32, i32
  }
  func.func @transform_5(%arg0: i32) -> (i32, i32) {
    %c0_i32 = arith.constant 0 : i32
    %c0_i32_0 = arith.constant 0 : i32
    %c0_i32_1 = arith.constant 0 : i32
    return %c0_i32, %c0_i32_0 : i32, i32
  }
  func.func @transform_6(%arg0: i32) -> (i32, i32) {
    %c0_i32 = arith.constant 0 : i32
    %c0_i32_0 = arith.constant 0 : i32
    return %arg0, %c0_i32 : i32, i32
  }
}

</mosaic_0001>

<bundles_post_ra>
// kernel: basic_block_forward.6
= control target key start
LH: loop header
LB: loop body
LE: loop exit
PB: predicated region body
PF: predicated region fallthrough
CT: control target
= control target key end

     0   :  { %s336_s0 = inlined_call_operand.vmem [shape: bf16[128,128], index: 0, kind: input, shape index: {}]   ;;  %s337_s1 = inlined_call_operand.vmem [shape: f32[1,128], index: 1, kind: input, shape index: {}]   ;;  %s338_s2 = inlined_call_operand.vmem [shape: f32[1,128], index: 2, kind: input, shape index: {}]   ;;  %s339_s3 = inlined_call_operand.vmem [shape: bf16[128,128], index: 3, kind: output, shape index: {}]  }
   0x1   :  { %v139_v0 = vld [vmem:[%s336_s0] sm:$0xff]   ;;  %v210_v5 = vld [vmem:[%s336_s0 + $0x8] sm:$0xff]   ;;  %v211_v8 = vld [vmem:[%s336_s0 + $0x10] sm:$0xff]  }
   0x2   :  { %v252_v1 = vld [vmem:[%s337_s1] ss:$0 sm:$0xff]  ;;  %v140_v2 = vunpack.c.l.bf16 %v139_v0  ;;  %v141_v3 = vunpack.c.h.bf16 %v139_v0  ;;  %v144_v6 = vunpack.c.l.bf16 %v210_v5  ;;  %v145_v7 = vunpack.c.h.bf16 %v210_v5  ;;  %v212_v9 = vld [vmem:[%s336_s0 + $0x18] sm:$0xff]   ;;  %v214_v35 = vld [vmem:[%s336_s0 + $0x28] sm:$0xff]  }
   0x3   :  { %v257_v4 = vld [vmem:[%s338_s2] ss:$0 sm:$0xff]  ;;  %v148_v12 = vunpack.c.l.bf16 %v211_v8  ;;  %v149_v13 = vunpack.c.h.bf16 %v211_v8  ;;  %v152_v16 = vunpack.c.l.bf16 %v212_v9  ;;  %v153_v17 = vunpack.c.h.bf16 %v212_v9  ;;  %v215_v40 = vld [vmem:[%s336_s0 + $0x30] sm:$0xff]   ;;  %v216_v45 = vld [vmem:[%s336_s0 + $0x38] sm:$0xff]  }
   0x4   :  { %v50_v10 = vmul.f32 %v252_v1, %v140_v2  ;;  %v51_v11 = vmul.f32 %v252_v1, %v141_v3  ;;  %v52_v14 = vmul.f32 %v252_v1, %v144_v6  ;;  %v53_v15 = vmul.f32 %v252_v1, %v145_v7  ;;  %v213_v26 = vld [vmem:[%s336_s0 + $0x20] sm:$0xff]  }
   0x5   :  { %v54_v20 = vmul.f32 %v252_v1, %v148_v12  ;;  %v55_v21 = vmul.f32 %v252_v1, %v149_v13  ;;  %v56_v24 = vmul.f32 %v252_v1, %v152_v16  ;;  %v57_v25 = vmul.f32 %v252_v1, %v153_v17 }
   0x6   :  { %v70_v18 = vadd.f32 %v257_v4, %v50_v10  ;;  %v71_v19 = vadd.f32 %v257_v4, %v51_v11  ;;  %v72_v22 = vadd.f32 %v257_v4, %v52_v14  ;;  %v73_v23 = vadd.f32 %v257_v4, %v53_v15 }
   0x7   :  { %v74_v29 = vadd.f32 %v257_v4, %v54_v20  ;;  %v75_v30 = vadd.f32 %v257_v4, %v55_v21  ;;  %v76_v33 = vadd.f32 %v257_v4, %v56_v24  ;;  %v77_v34 = vadd.f32 %v257_v4, %v57_v25 }
   0x8   :  { %v86_v27 = vmax.f32 %v70_v18, 0.0  ;;  %v87_v28 = vmax.f32 %v71_v19, 0.0  ;;  %v88_v31 = vmax.f32 %v72_v22, 0.0  ;;  %v89_v32 = vmax.f32 %v73_v23, 0.0 }
   0x9   :  { %v90_v37 = vmax.f32 %v74_v29, 0.0  ;;  %v91_v38 = vmax.f32 %v75_v30, 0.0  ;;  %v156_v39 = vunpack.c.l.bf16 %v213_v26  ;;  %v92_v42 = vmax.f32 %v76_v33, 0.0 }
   0xa   :  { %v173_v36 = vpack.c.bf16 %v87_v28, %v86_v27  ;;  %v178_v41 = vpack.c.bf16 %v89_v32, %v88_v31  ;;  %v93_v43 = vmax.f32 %v77_v34, 0.0  ;;  %v157_v44 = vunpack.c.h.bf16 %v213_v26 }
   0xb   :  { %v183_v46 = vpack.c.bf16 %v91_v38, %v90_v37  ;;  %v58_v47 = vmul.f32 %v252_v1, %v156_v39  ;;  %v160_v48 = vunpack.c.l.bf16 %v214_v35  ;;  %v161_v49 = vunpack.c.h.bf16 %v214_v35 }
   0xc   :  { %174 = vst [vmem:[%s339_s3] sm:$0xff] %v173_v36   ;;  %v188_v50 = vpack.c.bf16 %v93_v43, %v92_v42  ;;  %v59_v51 = vmul.f32 %v252_v1, %v157_v44  ;;  %v164_v52 = vunpack.c.l.bf16 %v215_v40  ;;  %v165_v53 = vunpack.c.h.bf16 %v215_v40 }
   0xd   :  { %217 = vst [vmem:[%s339_s3 + $0x8] sm:$0xff] %v178_v41   ;;  %v78_v54 = vadd.f32 %v257_v4, %v58_v47  ;;  %v60_v55 = vmul.f32 %v252_v1, %v160_v48  ;;  %v61_v56 = vmul.f32 %v252_v1, %v161_v49  ;;  %v168_v57 = vunpack.c.l.bf16 %v216_v45 }
   0xe   :  { %218 = vst [vmem:[%s339_s3 + $0x10] sm:$0xff] %v183_v46   ;;  %v79_v58 = vadd.f32 %v257_v4, %v59_v51  ;;  %v62_v59 = vmul.f32 %v252_v1, %v164_v52  ;;  %v63_v60 = vmul.f32 %v252_v1, %v165_v53  ;;  %v169_v61 = vunpack.c.h.bf16 %v216_v45 }
   0xf   :  { %219 = vst [vmem:[%s339_s3 + $0x18] sm:$0xff] %v188_v50   ;;  %v94_v62 = vmax.f32 %v78_v54, 0.0  ;;  %v80_v63 = vadd.f32 %v257_v4, %v60_v55  ;;  %v81_v0 = vadd.f32 %v257_v4, %v61_v56  ;;  %v64_v2 = vmul.f32 %v252_v1, %v168_v57 }
  0x10   :  { %v95_v3 = vmax.f32 %v79_v58, 0.0  ;;  %v82_v5 = vadd.f32 %v257_v4, %v62_v59  ;;  %v83_v6 = vadd.f32 %v257_v4, %v63_v60  ;;  %v65_v7 = vmul.f32 %v252_v1, %v169_v61 }
  0x11   :  { %v96_v8 = vmax.f32 %v80_v63, 0.0  ;;  %v97_v9 = vmax.f32 %v81_v0, 0.0  ;;  %v84_v10 = vadd.f32 %v257_v4, %v64_v2 }
  0x12   :  { %v193_v11 = vpack.c.bf16 %v95_v3, %v94_v62  ;;  %v98_v12 = vmax.f32 %v82_v5, 0.0  ;;  %v99_v13 = vmax.f32 %v83_v6, 0.0  ;;  %v85_v14 = vadd.f32 %v257_v4, %v65_v7 }
  0x13   :  { %v198_v15 = vpack.c.bf16 %v97_v9, %v96_v8  ;;  %v100_v16 = vmax.f32 %v84_v10, 0.0 }
  0x14   :  { %220 = vst [vmem:[%s339_s3 + $0x20] sm:$0xff] %v193_v11   ;;  %v203_v17 = vpack.c.bf16 %v99_v13, %v98_v12  ;;  %v101_v18 = vmax.f32 %v85_v14, 0.0 }
  0x15   :  { %221 = vst [vmem:[%s339_s3 + $0x28] sm:$0xff] %v198_v15  }
  0x16   :  { %222 = vst [vmem:[%s339_s3 + $0x30] sm:$0xff] %v203_v17   ;;  %v208_v1 = vpack.c.bf16 %v101_v18, %v100_v16 }
  0x18   :  { %223 = vst [vmem:[%s339_s3 + $0x38] sm:$0xff] %v208_v1  }

// kernel: basic_block_forward.5
= control target key start
LH: loop header
LB: loop body
LE: loop exit
PB: predicated region body
PF: predicated region fallthrough
CT: control target
= control target key end

     0   :  { %s632_s1 = inlined_call_operand.vmem [shape: bf16[128,128], index: 1, kind: input, shape index: {}]   ;;  %s633_s0 = inlined_call_operand.vmem [shape: bf16[128,128], index: 0, kind: input, shape index: {}]   ;;  %s634_s2 = inlined_call_operand.vmem [shape: bf16[128,128], index: 2, kind: output, shape index: {0}]   ;;  %s635_s3 = inlined_call_operand.vmem [shape: f32[1,2,128], index: 3, kind: output, shape index: {1}]  }
   0x1   :  { %v456_v0 = vld [vmem:[%s632_s1 + $0x38] sm:$0xff]  ;;  %v455_v1 = vld [vmem:[%s632_s1 + $0x30] sm:$0xff]  ;;  %v454_v2 = vld [vmem:[%s632_s1 + $0x28] sm:$0xff] }
   0x2   :  { %177 = vmatpush.bf16.msra.mxu0 %v456_v0  ;;  %504 = vmatpush.bf16.msra.mxu1 %v456_v0  ;;  %v453_v3 = vld [vmem:[%s632_s1 + $0x20] sm:$0xff]  ;;  %v452_v4 = vld [vmem:[%s632_s1 + $0x18] sm:$0xff]  ;;  %v451_v5 = vld [vmem:[%s632_s1 + $0x10] sm:$0xff] }
   0x3   :  { %505 = vmatpush.bf16.msra.mxu2 %v456_v0  ;;  %506 = vmatpush.bf16.msra.mxu3 %v456_v0  ;;  %v450_v6 = vld [vmem:[%s632_s1 + $0x8] sm:$0xff]  ;;  %v449_v7 = vld [vmem:[%s632_s1] sm:$0xff]  ;;  %v443_v9 = vld [vmem:[%s633_s0 + $0x10] sm:$0xff] }
   0x4   :  { %v441_v8 = vld [vmem:[%s633_s0] sm:$0xff]  ;;  %v447_v11 = vld [vmem:[%s633_s0 + $0x30] sm:$0xff]  ;;  %v442_v12 = vld [vmem:[%s633_s0 + $0x8] sm:$0xff] }
   0x5   :  { %v445_v10 = vld [vmem:[%s633_s0 + $0x20] sm:$0xff]  ;;  %v444_v13 = vld [vmem:[%s633_s0 + $0x18] sm:$0xff]  ;;  %v446_v14 = vld [vmem:[%s633_s0 + $0x28] sm:$0xff] }
   0x6   :  { %178 = vmatpush.bf16.msra.mxu0 %v455_v1  ;;  %507 = vmatpush.bf16.msra.mxu1 %v455_v1  ;;  %v448_v15 = vld [vmem:[%s633_s0 + $0x38] sm:$0xff] }
   0x7   :  { %508 = vmatpush.bf16.msra.mxu2 %v455_v1  ;;  %509 = vmatpush.bf16.msra.mxu3 %v455_v1 }
   0xa   :  { %179 = vmatpush.bf16.msra.mxu0 %v454_v2  ;;  %510 = vmatpush.bf16.msra.mxu1 %v454_v2 }
   0xb   :  { %511 = vmatpush.bf16.msra.mxu2 %v454_v2  ;;  %512 = vmatpush.bf16.msra.mxu3 %v454_v2 }
   0xe   :  { %180 = vmatpush.bf16.msra.mxu0 %v453_v3  ;;  %513 = vmatpush.bf16.msra.mxu1 %v453_v3 }
   0xf   :  { %514 = vmatpush.bf16.msra.mxu2 %v453_v3  ;;  %515 = vmatpush.bf16.msra.mxu3 %v453_v3 }
  0x12   :  { %181 = vmatpush.bf16.msra.mxu0 %v452_v4  ;;  %516 = vmatpush.bf16.msra.mxu1 %v452_v4 }
  0x13   :  { %517 = vmatpush.bf16.msra.mxu2 %v452_v4  ;;  %518 = vmatpush.bf16.msra.mxu3 %v452_v4 }
  0x16   :  { %182 = vmatpush.bf16.msra.mxu0 %v451_v5  ;;  %519 = vmatpush.bf16.msra.mxu1 %v451_v5 }
  0x17   :  { %520 = vmatpush.bf16.msra.mxu2 %v451_v5  ;;  %521 = vmatpush.bf16.msra.mxu3 %v451_v5 }
  0x1a   :  { %183 = vmatpush.bf16.msra.mxu0 %v450_v6  ;;  %522 = vmatpush.bf16.msra.mxu1 %v450_v6 }
  0x1b   :  { %523 = vmatpush.bf16.msra.mxu2 %v450_v6  ;;  %524 = vmatpush.bf16.msra.mxu3 %v450_v6 }
  0x1e   :  { %184 = vmatpush.bf16.msra.mxu0 %v449_v7  ;;  %525 = vmatpush.bf16.msra.mxu1 %v449_v7 }
  0x1f   :  { %526 = vmatpush.bf16.msra.mxu2 %v449_v7  ;;  %527 = vmatpush.bf16.msra.mxu3 %v449_v7 }
  0x21   :  { %185 = vmatmul.bf16.vlgmr.msra.gmra.mxu0 %v441_v8  ;;  %195 = vmatmul.bf16.vlgmr.msra.gmra.mxu1 %v443_v9 }
  0x22   :  { %205 = vmatmul.bf16.vlgmr.msra.gmra.mxu2 %v445_v10  ;;  %215 = vmatmul.bf16.vlgmr.msra.gmra.mxu3 %v447_v11 }
  0x31   :  { %190 = vmatmul.bf16.gmra.mxu0 %v442_v12  ;;  %200 = vmatmul.bf16.gmra.mxu1 %v444_v13 }
  0x32   :  { %210 = vmatmul.bf16.gmra.mxu2 %v446_v14  ;;  %220 = vmatmul.bf16.gmra.mxu3 %v448_v15 }
  0x9e   :  { %v186_v16 = vpop.f32.mrf.mxu0  ;;  %v196_v17 = vpop.f32.mrf.mxu1 }
  0x9f   :  { %v331_v31 = vmul.f32 %v186_v16, %v186_v16  ;;  %v335_v45 = vmul.f32 %v196_v17, %v196_v17 }
  0xa5   :  { %v206_v18 = vpop.f32.mrf.mxu2  ;;  %v596_v19 = vpop.f32.mrf.mxu3 }
  0xa6   :  { %v188_v20 = vpop.f32.mrf.mxu0  ;;  %v198_v21 = vpop.f32.mrf.mxu1  ;;  %v339_v61 = vmul.f32 %v206_v18, %v206_v18  ;;  %v343_v9 = vmul.f32 %v596_v19, %v596_v19 }
  0xa7   :  { %v460_v22 = vpack.c.bf16 %v188_v20, %v186_v16  ;;  %v470_v23 = vpack.c.bf16 %v198_v21, %v196_v17  ;;  %v332_v30 = vmul.f32 %v188_v20, %v188_v20  ;;  %v309_v33 = vadd.f32 %v188_v20, %v186_v16 }
  0xa8   :  { %v336_v48 = vmul.f32 %v198_v21, %v198_v21 }
  0xa9   :  { %461 = vst [vmem:[%s634_s2] sm:$0xff] %v460_v22   ;;  %v347_v34 = vadd.f32 %v332_v30, %v331_v31 }
  0xaa   :  { %498 = vst [vmem:[%s634_s2 + $0x10] sm:$0xff] %v470_v23  }
  0xad   :  { %v208_v24 = vpop.f32.mrf.mxu2  ;;  %v218_v25 = vpop.f32.mrf.mxu3 }
  0xae   :  { %v191_v26 = vpop.f32.mrf.mxu0  ;;  %v201_v27 = vpop.f32.mrf.mxu1  ;;  %v480_v28 = vpack.c.bf16 %v208_v24, %v206_v18  ;;  %v490_v29 = vpack.c.bf16 %v218_v25, %v596_v19  ;;  %v340_v0 = vmul.f32 %v208_v24, %v208_v24  ;;  %v344_v12 = vmul.f32 %v218_v25, %v218_v25 }
  0xaf   :  { %v333_v32 = vmul.f32 %v191_v26, %v191_v26  ;;  %v310_v35 = vadd.f32 %v309_v33, %v191_v26  ;;  %v337_v51 = vmul.f32 %v201_v27, %v201_v27 }
  0xb0   :  { %500 = vst [vmem:[%s634_s2 + $0x20] sm:$0xff] %v480_v28  }
  0xb1   :  { %502 = vst [vmem:[%s634_s2 + $0x30] sm:$0xff] %v490_v29   ;;  %v348_v38 = vadd.f32 %v347_v34, %v333_v32 }
  0xb5   :  { %v211_v36 = vpop.f32.mrf.mxu2  ;;  %v221_v37 = vpop.f32.mrf.mxu3 }
  0xb6   :  { %v193_v39 = vpop.f32.mrf.mxu0  ;;  %v203_v40 = vpop.f32.mrf.mxu1  ;;  %v341_v4 = vmul.f32 %v211_v36, %v211_v36  ;;  %v345_v16 = vmul.f32 %v221_v37, %v221_v37 }
  0xb7   :  { %v465_v41 = vpack.c.bf16 %v193_v39, %v191_v26  ;;  %v311_v42 = vadd.f32 %v310_v35, %v193_v39  ;;  %v334_v43 = vmul.f32 %v193_v39, %v193_v39  ;;  %v475_v44 = vpack.c.bf16 %v203_v40, %v201_v27 }
  0xb8   :  { %v338_v59 = vmul.f32 %v203_v40, %v203_v40 }
  0xb9   :  { %497 = vst [vmem:[%s634_s2 + $0x8] sm:$0xff] %v465_v41   ;;  %v312_v46 = vadd.f32 %v311_v42, %v196_v17  ;;  %v349_v47 = vadd.f32 %v348_v38, %v334_v43 }
  0xba   :  { %499 = vst [vmem:[%s634_s2 + $0x18] sm:$0xff] %v475_v44  }
  0xbb   :  { %v350_v49 = vadd.f32 %v349_v47, %v335_v45  ;;  %v313_v50 = vadd.f32 %v312_v46, %v198_v21 }
  0xbd   :  { %v314_v52 = vadd.f32 %v313_v50, %v201_v27  ;;  %v351_v53 = vadd.f32 %v350_v49, %v336_v48  ;;  %v213_v54 = vpop.f32.mrf.mxu2  ;;  %v223_v55 = vpop.f32.mrf.mxu3 }
  0xbe   :  { %v485_v56 = vpack.c.bf16 %v213_v54, %v211_v36  ;;  %v495_v57 = vpack.c.bf16 %v223_v55, %v221_v37  ;;  %v342_v8 = vmul.f32 %v213_v54, %v213_v54  ;;  %v346_v21 = vmul.f32 %v223_v55, %v223_v55 }
  0xbf   :  { %v315_v58 = vadd.f32 %v314_v52, %v203_v40  ;;  %v352_v60 = vadd.f32 %v351_v53, %v337_v51 }
  0xc0   :  { %501 = vst [vmem:[%s634_s2 + $0x28] sm:$0xff] %v485_v56  }
  0xc1   :  { %v316_v62 = vadd.f32 %v315_v58, %v206_v18  ;;  %v353_v63 = vadd.f32 %v352_v60, %v338_v59  ;;  %503 = vst [vmem:[%s634_s2 + $0x38] sm:$0xff] %v495_v57  }
  0xc3   :  { %v354_v1 = vadd.f32 %v353_v63, %v339_v61  ;;  %v317_v2 = vadd.f32 %v316_v62, %v208_v24 }
  0xc5   :  { %v318_v3 = vadd.f32 %v317_v2, %v211_v36  ;;  %v355_v5 = vadd.f32 %v354_v1, %v340_v0 }
  0xc7   :  { %v356_v6 = vadd.f32 %v355_v5, %v341_v4  ;;  %v319_v7 = vadd.f32 %v318_v3, %v213_v54 }
  0xc9   :  { %v320_v10 = vadd.f32 %v319_v7, %v596_v19  ;;  %v357_v11 = vadd.f32 %v356_v6, %v342_v8 }
  0xcb   :  { %v358_v13 = vadd.f32 %v357_v11, %v343_v9  ;;  %v321_v14 = vadd.f32 %v320_v10, %v218_v25 }
  0xcd   :  { %v322_v15 = vadd.f32 %v321_v14, %v221_v37  ;;  %v359_v17 = vadd.f32 %v358_v13, %v344_v12 }
  0xcf   :  { %v360_v18 = vadd.f32 %v359_v17, %v345_v16  ;;  %v323_v20 = vadd.f32 %v322_v15, %v223_v55 }
  0xd1   :  { %v324_v22 = vrot.slane %v323_v20, 4  ;;  %v361_v23 = vadd.f32 %v360_v18, %v346_v21 }
  0xd3   :  { %v325_v24 = vadd.f32 %v324_v22, %v323_v20  ;;  %v362_v26 = vrot.slane %v361_v23, 4 }
  0xd5   :  { %v326_v27 = vrot.slane %v325_v24, 2  ;;  %v363_v28 = vadd.f32 %v362_v26, %v361_v23 }
  0xd7   :  { %v327_v29 = vadd.f32 %v326_v27, %v325_v24  ;;  %v364_v30 = vrot.slane %v363_v28, 2 }
  0xd9   :  { %v328_v31 = vrot.slane %v327_v29, 1  ;;  %v365_v19 = vadd.f32 %v364_v30, %v363_v28 }
  0xdb   :  { %v329_v32 = vadd.f32 %v328_v31, %v327_v29  ;;  %v366_v33 = vrot.slane %v365_v19, 1 }
  0xdd   :  { %330 = vst [vmem:[%s635_s3] sm:$0x1] %v329_v32  ;;  %v367_v25 = vadd.f32 %v366_v33, %v365_v19 }
  0xdf   :  { %368 = vst [vmem:[%s635_s3 + $0x1] sm:$0x1] %v367_v25 }

// kernel: basic_block_forward.9
= control target key start
LH: loop header
LB: loop body
LE: loop exit
PB: predicated region body
PF: predicated region fallthrough
CT: control target
= control target key end

     0   :  { %s516_s0 = inlined_call_operand.vmem [shape: bf16[128,128], index: 0, kind: input, shape index: {}]   ;;  %s517_s1 = inlined_call_operand.vmem [shape: f32[1,128], index: 1, kind: input, shape index: {}]   ;;  %s518_s2 = inlined_call_operand.vmem [shape: f32[1,128], index: 2, kind: input, shape index: {}]   ;;  %s519_s3 = inlined_call_operand.vmem [shape: bf16[128,128], index: 3, kind: input, shape index: {}]   ;;  %s520_s4 = inlined_call_operand.vmem [shape: f32[1,128], index: 4, kind: input, shape index: {}]   ;;  %s521_s5 = inlined_call_operand.vmem [shape: f32[1,128], index: 5, kind: input, shape index: {}]   ;;  %s522_s6 = inlined_call_operand.vmem [shape: f32[128,128], index: 6, kind: output, shape index: {}]  }
   0x1   :  { %v220_v0 = vld [vmem:[%s516_s0] sm:$0xff]   ;;  %v283_v11 = vld [vmem:[%s516_s0 + $0x8] sm:$0xff]   ;;  %v284_v17 = vld [vmem:[%s516_s0 + $0x10] sm:$0xff]  }
   0x2   :  { %v342_v1 = vld [vmem:[%s517_s1] ss:$0 sm:$0xff]  ;;  %v221_v2 = vunpack.c.l.bf16 %v220_v0  ;;  %v222_v5 = vunpack.c.h.bf16 %v220_v0  ;;  %v290_v12 = vld [vmem:[%s519_s3 + $0x8] sm:$0xff]   ;;  %v225_v15 = vunpack.c.l.bf16 %v283_v11  ;;  %v291_v18 = vld [vmem:[%s519_s3 + $0x10] sm:$0xff]   ;;  %v226_v22 = vunpack.c.h.bf16 %v283_v11 }
   0x3   :  { %v347_v3 = vld [vmem:[%s518_s2] ss:$0 sm:$0xff]  ;;  %v257_v16 = vunpack.c.l.bf16 %v290_v12  ;;  %v258_v23 = vunpack.c.h.bf16 %v290_v12  ;;  %v229_v26 = vunpack.c.l.bf16 %v284_v17  ;;  %v261_v27 = vunpack.c.l.bf16 %v291_v18  ;;  %v285_v32 = vld [vmem:[%s516_s0 + $0x18] sm:$0xff]  }
   0x4   :  { %v252_v4 = vld [vmem:[%s519_s3] sm:$0xff]   ;;  %v59_v9 = vmul.f32 %v342_v1, %v221_v2  ;;  %v60_v10 = vmul.f32 %v342_v1, %v222_v5  ;;  %v61_v24 = vmul.f32 %v342_v1, %v225_v15  ;;  %v62_v30 = vmul.f32 %v342_v1, %v226_v22  ;;  %v292_v45 = vld [vmem:[%s519_s3 + $0x18] sm:$0xff]  }
   0x5   :  { %v253_v6 = vunpack.c.l.bf16 %v252_v4  ;;  %v355_v7 = vld [vmem:[%s520_s4] ss:$0 sm:$0xff]  ;;  %v254_v8 = vunpack.c.h.bf16 %v252_v4  ;;  %v63_v34 = vmul.f32 %v342_v1, %v229_v26  ;;  %v230_v36 = vunpack.c.h.bf16 %v284_v17 }
   0x6   :  { %v79_v19 = vadd.f32 %v347_v3, %v59_v9  ;;  %v377_v20 = vld [vmem:[%s521_s5] ss:$0 sm:$0xff]  ;;  %v80_v21 = vadd.f32 %v347_v3, %v60_v10  ;;  %v133_v25 = vmul.f32 %v355_v7, %v257_v16  ;;  %v134_v31 = vmul.f32 %v355_v7, %v258_v23  ;;  %v294_v16 = vld [vmem:[%s519_s3 + $0x28] sm:$0xff]  }
   0x7   :  { %v131_v13 = vmul.f32 %v355_v7, %v253_v6  ;;  %v132_v14 = vmul.f32 %v355_v7, %v254_v8  ;;  %v81_v33 = vadd.f32 %v347_v3, %v61_v24  ;;  %v135_v35 = vmul.f32 %v355_v7, %v261_v27  ;;  %v286_v58 = vld [vmem:[%s516_s0 + $0x20] sm:$0xff]   ;;  %v287_v6 = vld [vmem:[%s516_s0 + $0x28] sm:$0xff]  }
   0x8   :  { %v82_v39 = vadd.f32 %v347_v3, %v62_v30  ;;  %v262_v40 = vunpack.c.h.bf16 %v291_v18  ;;  %v83_v42 = vadd.f32 %v347_v3, %v63_v34  ;;  %v64_v43 = vmul.f32 %v342_v1, %v230_v36  ;;  %v293_v59 = vld [vmem:[%s519_s3 + $0x20] sm:$0xff]   ;;  %v288_v30 = vld [vmem:[%s516_s0 + $0x30] sm:$0xff]  }
   0x9   :  { %v147_v28 = vadd.f32 %v131_v13, %v79_v19  ;;  %v148_v29 = vadd.f32 %v132_v14, %v80_v21  ;;  %v149_v41 = vadd.f32 %v133_v25, %v81_v33  ;;  %v233_v44 = vunpack.c.l.bf16 %v285_v32 }
   0xa   :  { %v150_v48 = vadd.f32 %v134_v31, %v82_v39  ;;  %v136_v49 = vmul.f32 %v355_v7, %v262_v40  ;;  %v151_v51 = vadd.f32 %v135_v35, %v83_v42  ;;  %v84_v52 = vadd.f32 %v347_v3, %v64_v43  ;;  %v295_v35 = vld [vmem:[%s519_s3 + $0x30] sm:$0xff]  }
   0xb   :  { %v167_v37 = vadd.f32 %v377_v20, %v147_v28  ;;  %v168_v38 = vadd.f32 %v377_v20, %v148_v29  ;;  %v169_v50 = vadd.f32 %v377_v20, %v149_v41  ;;  %v65_v53 = vmul.f32 %v342_v1, %v233_v44 }
   0xc   :  { %v170_v54 = vadd.f32 %v377_v20, %v150_v48  ;;  %v265_v55 = vunpack.c.l.bf16 %v292_v45  ;;  %v234_v56 = vunpack.c.h.bf16 %v285_v32  ;;  %v266_v57 = vunpack.c.h.bf16 %v292_v45 }
   0xd   :  { %v183_v46 = vmax.f32 %v167_v37, 0.0  ;;  %v184_v47 = vmax.f32 %v168_v38, 0.0  ;;  %v185_v60 = vmax.f32 %v169_v50, 0.0  ;;  %v171_v61 = vadd.f32 %v377_v20, %v151_v51 }
   0xe   :  { %v152_v62 = vadd.f32 %v136_v49, %v84_v52  ;;  %v85_v63 = vadd.f32 %v347_v3, %v65_v53  ;;  %v186_v0 = vmax.f32 %v170_v54, 0.0  ;;  %v137_v2 = vmul.f32 %v355_v7, %v265_v55  ;;  %v289_v52 = vld [vmem:[%s516_s0 + $0x38] sm:$0xff]  }
   0xf   :  { %199 = vst [vmem:[%s522_s6] sm:$0xff] %v183_v46  ;;  %v66_v4 = vmul.f32 %v342_v1, %v234_v56  ;;  %v138_v5 = vmul.f32 %v355_v7, %v266_v57  ;;  %v187_v8 = vmax.f32 %v171_v61, 0.0  ;;  %v237_v10 = vunpack.c.l.bf16 %v286_v58  ;;  %v296_v53 = vld [vmem:[%s519_s3 + $0x38] sm:$0xff]  }
  0x10   :  { %200 = vst [vmem:[%s522_s6 + $0x8] sm:$0xff] %v184_v47  ;;  %v172_v9 = vadd.f32 %v377_v20, %v152_v62  ;;  %v269_v11 = vunpack.c.l.bf16 %v293_v59  ;;  %v153_v12 = vadd.f32 %v137_v2, %v85_v63  ;;  %v238_v14 = vunpack.c.h.bf16 %v286_v58 }
  0x11   :  { %201 = vst [vmem:[%s522_s6 + $0x10] sm:$0xff] %v185_v60  ;;  %v86_v13 = vadd.f32 %v347_v3, %v66_v4  ;;  %v270_v15 = vunpack.c.h.bf16 %v293_v59  ;;  %v67_v18 = vmul.f32 %v342_v1, %v237_v10  ;;  %v241_v21 = vunpack.c.l.bf16 %v287_v6 }
  0x12   :  { %202 = vst [vmem:[%s522_s6 + $0x18] sm:$0xff] %v186_v0  ;;  %v188_v17 = vmax.f32 %v172_v9, 0.0  ;;  %v139_v19 = vmul.f32 %v355_v7, %v269_v11  ;;  %v173_v22 = vadd.f32 %v377_v20, %v153_v12  ;;  %v68_v24 = vmul.f32 %v342_v1, %v238_v14 }
  0x13   :  { %203 = vst [vmem:[%s522_s6 + $0x20] sm:$0xff] %v187_v8  ;;  %v154_v23 = vadd.f32 %v138_v5, %v86_v13  ;;  %v140_v25 = vmul.f32 %v355_v7, %v270_v15  ;;  %v87_v26 = vadd.f32 %v347_v3, %v67_v18  ;;  %v69_v27 = vmul.f32 %v342_v1, %v241_v21 }
  0x14   :  { %204 = vst [vmem:[%s522_s6 + $0x28] sm:$0xff] %v188_v17  ;;  %v273_v28 = vunpack.c.l.bf16 %v294_v16  ;;  %v242_v29 = vunpack.c.h.bf16 %v287_v6  ;;  %v189_v31 = vmax.f32 %v173_v22, 0.0  ;;  %v88_v33 = vadd.f32 %v347_v3, %v68_v24 }
  0x15   :  { %v174_v32 = vadd.f32 %v377_v20, %v154_v23  ;;  %v274_v34 = vunpack.c.h.bf16 %v294_v16  ;;  %v155_v36 = vadd.f32 %v139_v19, %v87_v26  ;;  %v89_v37 = vadd.f32 %v347_v3, %v69_v27 }
  0x16   :  { %v141_v38 = vmul.f32 %v355_v7, %v273_v28  ;;  %v70_v39 = vmul.f32 %v342_v1, %v242_v29  ;;  %205 = vst [vmem:[%s522_s6 + $0x30] sm:$0xff] %v189_v31  ;;  %v156_v41 = vadd.f32 %v140_v25, %v88_v33  ;;  %v245_v43 = vunpack.c.l.bf16 %v288_v30 }
  0x17   :  { %v190_v40 = vmax.f32 %v174_v32, 0.0  ;;  %v142_v42 = vmul.f32 %v355_v7, %v274_v34  ;;  %v175_v44 = vadd.f32 %v377_v20, %v155_v36  ;;  %v277_v47 = vunpack.c.l.bf16 %v295_v35 }
  0x18   :  { %v157_v45 = vadd.f32 %v141_v38, %v89_v37  ;;  %v90_v46 = vadd.f32 %v347_v3, %v70_v39  ;;  %v176_v48 = vadd.f32 %v377_v20, %v156_v41  ;;  %v71_v49 = vmul.f32 %v342_v1, %v245_v43 }
  0x19   :  { %206 = vst [vmem:[%s522_s6 + $0x38] sm:$0xff] %v190_v40  ;;  %v246_v50 = vunpack.c.h.bf16 %v288_v30  ;;  %v278_v51 = vunpack.c.h.bf16 %v295_v35  ;;  %v191_v54 = vmax.f32 %v175_v44, 0.0  ;;  %v143_v57 = vmul.f32 %v355_v7, %v277_v47 }
  0x1a   :  { %v177_v55 = vadd.f32 %v377_v20, %v157_v45  ;;  %v158_v56 = vadd.f32 %v142_v42, %v90_v46  ;;  %v192_v58 = vmax.f32 %v176_v48, 0.0  ;;  %v91_v59 = vadd.f32 %v347_v3, %v71_v49 }
  0x1b   :  { %v72_v60 = vmul.f32 %v342_v1, %v246_v50  ;;  %v144_v61 = vmul.f32 %v355_v7, %v278_v51  ;;  %207 = vst [vmem:[%s522_s6 + $0x40] sm:$0xff] %v191_v54  ;;  %v249_v0 = vunpack.c.l.bf16 %v289_v52  ;;  %v281_v2 = vunpack.c.l.bf16 %v296_v53 }
  0x1c   :  { %v193_v62 = vmax.f32 %v177_v55, 0.0  ;;  %v178_v63 = vadd.f32 %v377_v20, %v158_v56  ;;  %208 = vst [vmem:[%s522_s6 + $0x48] sm:$0xff] %v192_v58  ;;  %v159_v4 = vadd.f32 %v143_v57, %v91_v59  ;;  %v250_v6 = vunpack.c.h.bf16 %v289_v52 }
  0x1d   :  { %v92_v5 = vadd.f32 %v347_v3, %v72_v60  ;;  %v282_v8 = vunpack.c.h.bf16 %v296_v53  ;;  %v73_v10 = vmul.f32 %v342_v1, %v249_v0  ;;  %v145_v11 = vmul.f32 %v355_v7, %v281_v2 }
  0x1e   :  { %209 = vst [vmem:[%s522_s6 + $0x50] sm:$0xff] %v193_v62  ;;  %v194_v9 = vmax.f32 %v178_v63, 0.0  ;;  %v179_v12 = vadd.f32 %v377_v20, %v159_v4  ;;  %v74_v14 = vmul.f32 %v342_v1, %v250_v6 }
  0x1f   :  { %v160_v13 = vadd.f32 %v144_v61, %v92_v5  ;;  %v146_v15 = vmul.f32 %v355_v7, %v282_v8  ;;  %v93_v16 = vadd.f32 %v347_v3, %v73_v10 }
  0x20   :  { %210 = vst [vmem:[%s522_s6 + $0x58] sm:$0xff] %v194_v9  ;;  %v195_v17 = vmax.f32 %v179_v12, 0.0  ;;  %v94_v19 = vadd.f32 %v347_v3, %v74_v14 }
  0x21   :  { %v180_v18 = vadd.f32 %v377_v20, %v160_v13  ;;  %v161_v21 = vadd.f32 %v145_v11, %v93_v16 }
  0x22   :  { %211 = vst [vmem:[%s522_s6 + $0x60] sm:$0xff] %v195_v17  ;;  %v162_v1 = vadd.f32 %v146_v15, %v94_v19 }
  0x23   :  { %v196_v22 = vmax.f32 %v180_v18, 0.0  ;;  %v181_v7 = vadd.f32 %v377_v20, %v161_v21 }
  0x24   :  { %v182_v23 = vadd.f32 %v377_v20, %v162_v1 }
  0x25   :  { %212 = vst [vmem:[%s522_s6 + $0x68] sm:$0xff] %v196_v22  ;;  %v197_v24 = vmax.f32 %v181_v7, 0.0 }
  0x26   :  { %v198_v25 = vmax.f32 %v182_v23, 0.0 }
  0x27   :  { %213 = vst [vmem:[%s522_s6 + $0x70] sm:$0xff] %v197_v24 }
  0x28   :  { %214 = vst [vmem:[%s522_s6 + $0x78] sm:$0xff] %v198_v25 }

</bundles_post_ra>
